<compile_context>
chip_gen: v7x
topology: tpu7x:2x2x1
jax: 0.10.0
libtpu: 0.0.40
codegen_flags: <defaults>
</compile_context>

<pallas_src>
import functools
import math

import jax
import jax.numpy as jnp
from jax.experimental import pallas as pl
from jax.experimental.pallas import tpu as pltpu

LEAKY_SLOPE = 0.1
KH = KW = 3
MATMUL_DTYPE = jnp.float32     # set to jnp.bfloat16 on v6e/v7x for 2x MXU rate


def _leaky(x):
    return jnp.where(x > 0, x, LEAKY_SLOPE * x)


def _round_up8(c):
    return max(8, -(-c // 8) * 8)


@functools.lru_cache(maxsize=None)
def _roll_matches_numpy():
    """One-time probe of pltpu.roll's convention (True iff out[i]==x[i-shift])."""
    def probe(x_ref, o_ref):
        o_ref[...] = pltpu.roll(x_ref[...], 1, 1)
    x = jax.lax.broadcasted_iota(jnp.float32, (8, 128), 1)
    out = pl.pallas_call(
        probe, out_shape=jax.ShapeDtypeStruct((8, 128), jnp.float32))(x)
    return bool(jax.device_get(out)[0, 1] == 0.0)


# ----------------------------------------------------------------------------
# Fully fused network kernel (all blocks + pool + fc), grid over batch.
# ----------------------------------------------------------------------------
def make_fused_kernel(H, W, block_meta, roll_np):
    """block_meta: tuple of (cin_padded, cout_padded, dilation, has_down)."""
    HW = H * W

    def shifted(act, h_idx, w_idx, dh, dw):
        # shifted[c, h*W + w] = act[c, (h+dh)*W + (w+dw)], zero out of bounds
        # (this realizes the ZeroPad2d halo of the PyTorch block).
        s = dh * W + dw
        if s == 0:
            rolled = act
        else:
            amt = (-s) % HW if roll_np else s % HW
            rolled = pltpu.roll(act, amt, 1)            # lane rotation (XLU)
        valid = ((h_idx >= -dh) & (h_idx < H - dh) &
                 (w_idx >= -dw) & (w_idx < W - dw))     # (1, HW) bool
        return jnp.where(valid, rolled, 0.0)

    def im2col(act, h_idx, w_idx, dil):
        parts = [shifted(act, h_idx, w_idx, (kh - 1) * dil, (kw - 1) * dil)
                 for kh in range(KH) for kw in range(KW)]
        return jnp.concatenate(parts, axis=0)           # (9*C, HW)

    def mm(a, b):
        return jnp.dot(a.astype(MATMUL_DTYPE), b.astype(MATMUL_DTYPE),
                       preferred_element_type=jnp.float32)

    def kernel(*refs):
        x_ref, pos_ref, out_ref = refs[0], refs[1], refs[-1]
        wrefs = refs[2:-1]

        pos = pos_ref[...]                               # (2, HW) int32
        h_idx, w_idx = pos[0:1, :], pos[1:2, :]

        act = x_ref[0]                                   # (C0p, HW) float32
        i = 0
        for _cin, _cout, dil, has_down in block_meta:
            w1, b1 = wrefs[i][...], wrefs[i + 1][...]
            w2, b2 = wrefs[i + 2][...], wrefs[i + 3][...]
            i += 4
            # dilated 3x3 conv -> LeakyReLU, twice; one MXU matmul per conv.
            h1 = _leaky(mm(w1, im2col(act, h_idx, w_idx, dil)) + b1)
            h2 = _leaky(mm(w2, im2col(h1, h_idx, w_idx, dil)) + b2)
            if has_down:                                 # 1x1-conv residual
                wd, bd = wrefs[i][...], wrefs[i + 1][...]
                i += 2
                res = mm(wd, act) + bd
            else:                                        # identity residual
                res = act
            act = jnp.maximum(h2 + res, 0.0)             # block's final ReLU

        # Head: fc is linear, so mean(fc(act)) == fc(mean(act)); doing the
        # matmul first keeps the lane axis at HW (lane-dense) until the end.
        wfc, bfc = wrefs[i][...], wrefs[i + 1][...]      # (NC, Cp), (NC, 1)
        logits = jnp.mean(mm(wfc, act), axis=1, keepdims=True) + bfc
        out_ref[0] = logits                              # (NC, 1)

    return kernel


# ----------------------------------------------------------------------------
# Wrapper: layout/padding plumbing + pallas_call
# ----------------------------------------------------------------------------
def temporal_conv_net_2d(x_nchw, params):
    """Forward pass.  x_nchw: (B, C, H, W) float32 (PyTorch layout)."""
    B, C0, H, W = x_nchw.shape
    # AdaptiveAvgPool2d((16,16)) -> global avg pool collapses to one global
    # mean whenever H, W are multiples of 16 (equal-size pooling bins).
    # TODO(synk): non-divisible AdaptiveAvgPool2d bins not implemented.
    assert H % 16 == 0 and W % 16 == 0
    HW = H * W
    roll_np = _roll_matches_numpy()      # eager probe (outside any jit)

    c0p = _round_up8(C0)
    x = jnp.pad(x_nchw.reshape(B, C0, HW).astype(jnp.float32),
                ((0, 0), (0, c0p - C0), (0, 0)))

    # (h, w) index of every flattened spatial position, for the halo masks.
    cols = jnp.arange(HW, dtype=jnp.int32)
    pos = jnp.stack([cols // W, cols % W], axis=0)       # (2, HW)

    args = [x, pos]
    in_specs = [pl.BlockSpec((1, c0p, HW), lambda b: (b, 0, 0)),
                pl.BlockSpec((2, HW), lambda b: (0, 0))]

    def add_weight(w):
        args.append(w)
        nd = w.ndim
        in_specs.append(pl.BlockSpec(w.shape, lambda b, _n=nd: (0,) * _n))

    block_meta = []
    cin, cinp = C0, c0p
    for p in params["blocks"]:
        cout = p["w1"].shape[-1]
        coutp = _round_up8(cout)
        # HWIO conv weights -> (Cout_p, 9*Cin_p) matching the im2col row order
        # (tap-major, channel-minor).  Zero-padded channels stay exactly zero
        # through the whole network, so padding never changes the result.
        w1 = jnp.pad(p["w1"], ((0, 0), (0, 0), (0, cinp - cin),
                               (0, coutp - cout)))
        w1 = w1.transpose(3, 0, 1, 2).reshape(coutp, KH * KW * cinp)
        w2 = jnp.pad(p["w2"], ((0, 0), (0, 0), (0, coutp - cout),
                               (0, coutp - cout)))
        w2 = w2.transpose(3, 0, 1, 2).reshape(coutp, KH * KW * coutp)
        b1 = jnp.pad(p["b1"], (0, coutp - cout)).reshape(coutp, 1)
        b2 = jnp.pad(p["b2"], (0, coutp - cout)).reshape(coutp, 1)
        for w in (w1, b1, w2, b2):
            add_weight(w)
        if p["has_down"]:
            wd = jnp.pad(p["wd"], ((0, cinp - cin), (0, coutp - cout))).T
            bd = jnp.pad(p["bd"], (0, coutp - cout)).reshape(coutp, 1)
            add_weight(wd)
            add_weight(bd)
        block_meta.append((cinp, coutp, p["dil"], p["has_down"]))
        cin, cinp = cout, coutp

    num_classes = params["w_fc"].shape[-1]
    add_weight(jnp.pad(params["w_fc"], ((0, cinp - cin), (0, 0))).T)  # (NC,Cp)
    add_weight(params["b_fc"].reshape(num_classes, 1))                # (NC,1)

    out = pl.pallas_call(
        make_fused_kernel(H, W, tuple(block_meta), roll_np),
        out_shape=jax.ShapeDtypeStruct((B, num_classes, 1), jnp.float32),
        grid=(B,),
        in_specs=in_specs,
        out_specs=pl.BlockSpec((1, num_classes, 1), lambda b: (b, 0, 0)),
        compiler_params=pltpu.CompilerParams(
            dimension_semantics=("parallel",)),
    )(*args)
    return out.reshape(B, num_classes)


# ----------------------------------------------------------------------------
# Deterministic parameter init (shapes follow the PyTorch __init__)
# ----------------------------------------------------------------------------
def init_params(key, num_inputs, num_channels, num_classes):
    blocks = []
    cin = num_inputs
    for i, cout in enumerate(num_channels):
        dil = 2 ** i
        key, k1, k2, k3, k4, k5, k6 = jax.random.split(key, 7)
        bnd1 = 1.0 / math.sqrt(cin * KH * KW)
        bnd2 = 1.0 / math.sqrt(cout * KH * KW)
        blk = dict(
            w1=jax.random.uniform(k1, (KH, KW, cin, cout), jnp.float32,
                                  -bnd1, bnd1),
            b1=jax.random.uniform(k2, (cout,), jnp.float32, -bnd1, bnd1),
            w2=jax.random.uniform(k3, (KH, KW, cout, cout), jnp.float32,
                                  -bnd2, bnd2),
            b2=jax.random.uniform(k4, (cout,), jnp.float32, -bnd2, bnd2),
            dil=dil, has_down=(cin != cout))
        if blk["has_down"]:
            bnd = 1.0 / math.sqrt(cin)
            blk["wd"] = jax.random.uniform(k5, (cin, cout), jnp.float32,
                                           -bnd, bnd)
            blk["bd"] = jax.random.uniform(k6, (cout,), jnp.float32,
                                           -bnd, bnd)
        blocks.append(blk)
        cin = cout
    key, kf1, kf2 = jax.random.split(key, 3)
    bnd = 1.0 / math.sqrt(cin)
    return dict(
        blocks=blocks,
        w_fc=jax.random.uniform(kf1, (cin, num_classes), jnp.float32,
                                -bnd, bnd),
        b_fc=jax.random.uniform(kf2, (num_classes,), jnp.float32, -bnd, bnd))


# ----------------------------------------------------------------------------
# Pure-JAX reference (f32) for numerical verification
# ----------------------------------------------------------------------------
def ref_forward(x_nchw, params):
    x = jnp.transpose(x_nchw, (0, 2, 3, 1))              # NHWC

    def conv(v, w, b, dil):
        y = jax.lax.conv_general_dilated(
            v, w, window_strides=(1, 1), padding=[(dil, dil), (dil, dil)],
            rhs_dilation=(dil, dil),
            dimension_numbers=("NHWC", "HWIO", "NHWC"))
        return y + b.reshape(1, 1, 1, -1)

    for p in params["blocks"]:
        out = _leaky(conv(x, p["w1"], p["b1"], p["dil"]))
        out = _leaky(conv(out, p["w2"], p["b2"], p["dil"]))
        if p["has_down"]:
            res = jnp.einsum("bhwc,cd->bhwd", x, p["wd"]) + p["bd"]
        else:
            res = x
        x = jnp.maximum(out + res, 0.0)
    pooled = x.mean(axis=(1, 2))
    return pooled @ params["w_fc"] + params["b_fc"].reshape(1, -1)


if __name__ == "__main__":
    key = jax.random.PRNGKey(0)
    kx, kp = jax.random.split(key)

    B, Cin, H, W = 2, 4, 16, 16                # PyTorch-style NCHW input
    num_channels = (8, 8)                      # two blocks: dilation 1 and 2
    num_classes = 3

    x_nchw = jax.random.normal(kx, (B, Cin, H, W), jnp.float32)
    params = init_params(kp, Cin, num_channels, num_classes)

    out = jax.block_until_ready(temporal_conv_net_2d(x_nchw, params))

    ref = ref_forward(x_nchw, params)
    assert out.shape == (B, num_classes), out.shape
    assert jnp.allclose(out, ref, atol=1e-3, rtol=1e-3), (out, ref)
    print("KERNEL_OK")
</pallas_src>

<mosaic_0001>
module attributes {stable_mosaic.version = 11 : i64} {
  func.func @probe(%arg0: memref<8x128xf32, #tpu.memory_space<vmem>>, %arg1: memref<8x128xf32, #tpu.memory_space<vmem>>) attributes {dimension_semantics = [], scalar_prefetch = 0 : i64, scratch_operands = 0 : i64, tpu.core_type = #tpu.core_type<tc>} {
    %c0 = arith.constant 0 : index
    %c0_0 = arith.constant 0 : index
    %0 = vector.load %arg0[%c0, %c0_0] : memref<8x128xf32, #tpu.memory_space<vmem>>, vector<8x128xf32>
    %c1_i32 = arith.constant 1 : i32
    %1 = tpu.dynamic_rotate %0 by %c1_i32 dim 1 : vector<8x128xf32>, i32 -> vector<8x128xf32>
    %c0_1 = arith.constant 0 : index
    %c0_2 = arith.constant 0 : index
    %2 = vector.load %arg1[%c0_1, %c0_2] : memref<8x128xf32, #tpu.memory_space<vmem>>, vector<8x128xf32>
    tpu.vector_store %arg1[%c0_1, %c0_2], %1 {strides = array<i32>} : memref<8x128xf32, #tpu.memory_space<vmem>>, vector<8x128xf32>,
    return
  }
}

</mosaic_0001>

<bundles_post_ra>
// kernel: tpu_custom_call.1
= control target key start
LH: loop header
LB: loop body
LE: loop exit
PB: predicated region body
PF: predicated region fallthrough
CT: control target
= control target key end

     0   :  { %6 = vsyncpa [#allocation3], 0  ;;  %s128_s0 = inlined_call_operand.hbm [shape: f32[8,128], index: 0, kind: input, shape index: {}]   ;;  %s129_s1 = inlined_call_operand.hbm [shape: f32[8,128], index: 1, kind: output, shape index: {}]  }
   0x1   :  { %7 = vsyncpa [#allocation4], 0  ;;  %s91_s6 = smov [#allocation2]   ;;  %s43_s10 = scalar_lea.hbm %s128_s0, 128 }
   0x2   :  { %s14_s7 = sshll.u32 %s91_s6, 4  ;;  %p44_p0 = scmp.ne.s32.totalorder %s128_s0, %s43_s10  ;;  %s15_s7 = int_to_ptr.vmem [resolvable:$true] %s14_s7 }
   0x3   :  { %p47_p1 = scmp.lt.u32.totalorder %s43_s10, %s128_s0 }
   0x5   :  { %p49_p2 = pnand %p47_p1, %p44_p0 }
   0x7   :  { %52 = shalt.err (!%p49_p2)
}
   0x8   :  { %s53_s15 = scalar_lea.vmem %s15_s7, 128  ;;  %p58_p4 = scmp.lt.s32.totalorder %s15_s7, %s15_s7 }
   0x9   :  { %p54_p3 = scmp.ne.s32.totalorder %s15_s7, %s53_s15  ;;  %p59_p5 = scmp.lt.s32.totalorder %s53_s15, %s53_s15 }
   0xb   :  { %p60_p6 = por %p59_p5, %p58_p4 }
   0xd   :  { %p61_p7 = pnand %p60_p6, %p54_p3 }
   0xf   :  { %64 = shalt.err (!%p61_p7)
}
  0x10   :  { %17 = dma.hbm_to_vmem [thread:$0]  %s128_s0, 128, %s15_s7, [#allocation3]  }
  0x11   :  { %87 = dma.done.wait [#allocation3], 128  }
  0x12   :  { %88 = vsyncadd [#allocation3], 4294967168  ;;  %v21_v0 = vld [vmem:[#allocation2] sm:$0xff]  ;;  %s92_s18 = smov 1   ;;  %s93_s19 = smov [#allocation5]  }
  0x13   :  { %22 = vrot.lane.b32.xlu0 %v21_v0, %s92_s18  ;;  %s31_s20 = sshll.u32 %s93_s19, 4  ;;  %s32_s20 = int_to_ptr.vmem [resolvable:$true] %s31_s20 }
  0x14   :  { %s65_s21 = scalar_lea.vmem %s32_s20, 128  ;;  %p70_p9 = scmp.lt.s32.totalorder %s32_s20, %s32_s20 }
  0x15   :  { %p66_p8 = scmp.ne.s32.totalorder %s32_s20, %s65_s21  ;;  %p71_p10 = scmp.lt.s32.totalorder %s65_s21, %s65_s21 }
  0x17   :  { %p72_p11 = por %p71_p10, %p70_p9 }
  0x19   :  { %p73_p12 = pnand %p72_p11, %p66_p8 }
  0x85   :  { %v23_v1 = vpop.permute.xlu0 %22 }
  0x86   :  { %24 = vst [vmem:[#allocation5] sm:$0xff] %v23_v1 }
  0x87   :  { %76 = shalt.err (!%p73_p12)
}
  0x88   :  { %s77_s0 = scalar_lea.hbm %s129_s1, 128 }
  0x89   :  { %p78_p13 = scmp.ne.s32.totalorder %s129_s1, %s77_s0  ;;  %p81_p0 = scmp.lt.u32.totalorder %s77_s0, %s129_s1 }
  0x8b   :  { %p83_p1 = pnand %p81_p0, %p78_p13 }
  0x8d   :  { %86 = shalt.err (!%p83_p1)
}
  0x8e   :  { %34 = dma.vmem_to_hbm [thread:$0]  %s32_s20, 128, %s129_s1, [#allocation4]  }
  0x8f   :  { %89 = dma.done.wait [#allocation4], 128  }
  0x90   :  { %90 = vsyncadd [#allocation4], 4294967168 }
  0x91   :  { %38 = vsyncpa [#allocation3], 1 }
  0x92   :  { %39 = vsyncpa [#allocation4], 1 }

</bundles_post_ra>
